<compile_context>
chip_gen: v6e
topology: v6e:2x2x1
jax: 0.10.0
libtpu: 0.0.40
codegen_flags: <defaults>
</compile_context>

<pallas_src>
import jax
import jax.numpy as jnp
from jax.experimental import pallas as pl
from jax.experimental.pallas import tpu as pltpu


def _round_up(x, m):
    return ((x + m - 1) // m) * m


def _row_granule(dtype):
    # Sublane packing: f32 -> 8 rows/vreg, bf16 -> 16, int8/fp8 -> 32.
    return {4: 8, 2: 16, 1: 32}.get(jnp.dtype(dtype).itemsize, 8)


def _vmem_cap_bytes():
    # Per-core physical VMEM (v5e/v6e: 128 MiB, v7x: 64 MiB per TensorCore).
    try:
        cap = int(getattr(pltpu.get_tpu_info(), "vmem_capacity_bytes", 0))
        if cap > 0:
            return cap
    except Exception:
        pass
    return 64 << 20  # conservative fallback (v7x per-core size)


def _fpn_kernel(x_ref, w1_ref, b1_ref, w2_ref, b2_ref, w3_ref, b3_ref, o_ref):
    # Layer 1: MXU matmul (compute-dtype operands, f32 accumulation); f32 epilogue.
    h = jnp.dot(x_ref[...], w1_ref[...], preferred_element_type=jnp.float32)
    h = jnp.maximum(h + b1_ref[...], 0.0)
    # Layer 2: same pattern.
    m = jnp.dot(h.astype(w2_ref.dtype), w2_ref[...], preferred_element_type=jnp.float32)
    m = jnp.maximum(m + b2_ref[...], 0.0)
    # Layer 3 (no activation).
    o = jnp.dot(m.astype(w3_ref.dtype), w3_ref[...], preferred_element_type=jnp.float32)
    o_ref[...] = (o + b3_ref[...]).astype(o_ref.dtype)


def prepare_params(params, *, compute_dtype=jnp.bfloat16):
    """Pad internal dims to 128 lanes and cast to the MXU dtype ONCE.

    Weights wi are (in_features, out_features); biases bi are (1, out_features).
    Returns a dict reusable across many fpn_forward calls (avoids per-call
    pad/convert HBM traffic)."""
    if isinstance(params, dict) and params.get("_prepared", False):
        return params
    w1, b1 = params["w1"], params["b1"]
    w2, b2 = params["w2"], params["b2"]
    w3, b3 = params["w3"], params["b3"]
    Cin, Chid = w1.shape
    Cmid = w2.shape[1]
    Cout = w3.shape[1]

    # Internal feature dims -> multiples of 128 (zeros are exact through bias+ReLU).
    Chidp = _round_up(Chid, 128)
    Cmidp = _round_up(Cmid, 128)
    # Output dim: only pad if the HBM writeback inflation is small (<= 2x);
    # tiny Cout stays unpadded (masked vst beats an 8x wider f32 out-stream).
    Coutp_full = _round_up(max(Cout, 1), 128)
    Coutp = Coutp_full if Coutp_full <= 2 * Cout else Cout

    w1 = jnp.pad(w1, ((0, 0), (0, Chidp - Chid)))
    b1 = jnp.pad(b1, ((0, 0), (0, Chidp - Chid)))
    w2 = jnp.pad(w2, ((0, Chidp - Chid), (0, Cmidp - Cmid)))
    b2 = jnp.pad(b2, ((0, 0), (0, Cmidp - Cmid)))
    w3 = jnp.pad(w3, ((0, Cmidp - Cmid), (0, Coutp - Cout)))
    b3 = jnp.pad(b3, ((0, 0), (0, Coutp - Cout)))

    return {
        "w1": w1.astype(compute_dtype), "b1": b1.astype(jnp.float32),
        "w2": w2.astype(compute_dtype), "b2": b2.astype(jnp.float32),
        "w3": w3.astype(compute_dtype), "b3": b3.astype(jnp.float32),
        "_prepared": True,
        "_dims": (Cin, Chidp, Cmidp, Coutp, Cout),
        "_compute_dtype": jnp.dtype(compute_dtype),
    }


# Cached feature flag: set to False once if this Pallas build rejects
# pipeline_mode=pl.Buffered(...) so we never pay the failed compile twice.
_PIPELINE_MODE_OK = True


def fpn_forward(fp, params, *, batch_tile=None):
    """FPN forward. fp: (B, in_channals). params: raw {w1..b3} or prepare_params output."""
    global _PIPELINE_MODE_OK
    p = prepare_params(params)
    compute_dtype = p["_compute_dtype"]
    Cin, Chidp, Cmidp, Coutp, Cout = p["_dims"]
    B, Cin_x = fp.shape
    assert Cin_x == Cin, f"fp has {Cin_x} features, weights expect {Cin}"
    out_dtype = fp.dtype

    cbytes = jnp.dtype(compute_dtype).itemsize
    obytes = jnp.dtype(out_dtype).itemsize
    gran = _row_granule(compute_dtype)

    # ---- chip-aware VMEM budget -> largest batch tile that fits -------------
    cap = int(0.85 * _vmem_cap_bytes())
    w_bytes = (Cin * Chidp + Chidp * Cmidp + Cmidp * Coutp) * cbytes
    b_bytes = (Chidp + Cmidp + Coutp) * 4
    fixed = 2 * (w_bytes + b_bytes)  # worst case: double-buffered weights
    # Per batch-row bytes: x tile (<=3 buffers), out tile (2 buffers), plus the
    # f32 intermediates h/m, their compute-dtype recasts, and the f32 o epilogue.
    per_row = (3 * Cin * cbytes + 2 * Coutp * obytes
               + Chidp * (4 + cbytes) + Cmidp * (4 + cbytes) + Coutp * 4)
    tb_vmem = max(gran, ((cap - fixed) // max(per_row, 1)) // gran * gran)

    if batch_tile is None:
        tb = min(_round_up(B, gran), tb_vmem, 4096)
        # For large batches keep >= 2 grid steps so the "parallel" grid axis can
        # shard across v7x's two TensorCores (negligible cost on v5e/v6e).
        if B >= 256:
            tb = min(tb, _round_up(pl.cdiv(B, 2), gran))
    else:
        tb = min(int(batch_tile), tb_vmem)
    tb = max(gran, _round_up(tb, gran))

    x = fp.astype(compute_dtype)
    Bp = _round_up(B, tb)
    if Bp != B:
        x = jnp.pad(x, ((0, Bp - B), (0, 0)))
    n_steps = Bp // tb
    grid = (n_steps,)

    vmem_needed = fixed + tb * per_row
    vmem_limit = int(min(max(vmem_needed + (2 << 20), 4 << 20), cap))

    cost = pl.CostEstimate(
        flops=int(2 * Bp * (Cin * Chidp + Chidp * Cmidp + Cmidp * Coutp)),
        transcendentals=0,
        bytes_accessed=int(Bp * Cin * cbytes + Bp * Coutp * obytes + w_bytes + b_bytes),
    )

    def batch_map(i):
        return (i, 0)

    def rep_map(i):
        return (0, 0)

    def build(use_pipeline_modes):
        # Grid-invariant weights/biases: single-buffer to halve their VMEM
        # footprint. Streamed x tile: 3-deep pipeline on long grids so the tiny
        # per-step compute doesn't expose the input DMA latency.
        wkw = dict(pipeline_mode=pl.Buffered(1)) if use_pipeline_modes else {}
        skw = (dict(pipeline_mode=pl.Buffered(3))
               if (use_pipeline_modes and n_steps >= 4) else {})
        in_specs = [
            pl.BlockSpec((tb, Cin), batch_map, **skw),      # x (streamed over batch)
            pl.BlockSpec((Cin, Chidp), rep_map, **wkw),     # w1 (lane-padded cols)
            pl.BlockSpec((1, Chidp), rep_map, **wkw),       # b1
            pl.BlockSpec((Chidp, Cmidp), rep_map, **wkw),   # w2
            pl.BlockSpec((1, Cmidp), rep_map, **wkw),       # b2
            pl.BlockSpec((Cmidp, Coutp), rep_map, **wkw),   # w3
            pl.BlockSpec((1, Coutp), rep_map, **wkw),       # b3
        ]
        return pl.pallas_call(
            _fpn_kernel,
            out_shape=jax.ShapeDtypeStruct((Bp, Coutp), out_dtype),
            grid_spec=pltpu.PrefetchScalarGridSpec(
                num_scalar_prefetch=0,
                grid=grid,
                in_specs=in_specs,
                out_specs=pl.BlockSpec((tb, Coutp), batch_map),
            ),
            compiler_params=pltpu.CompilerParams(
                dimension_semantics=("parallel",),
                vmem_limit_bytes=vmem_limit,
            ),
            cost_estimate=cost,
        )

    args = (x, p["w1"], p["b1"], p["w2"], p["b2"], p["w3"], p["b3"])
    if _PIPELINE_MODE_OK:
        try:
            out = build(True)(*args)
        except (pltpu.LoweringException, NotImplementedError, TypeError, ValueError):
            # Only pipeline_mode rejection is tolerated; anything else surfaces.
            _PIPELINE_MODE_OK = False
            out = build(False)(*args)
    else:
        out = build(False)(*args)

    return out[:B, :Cout]


def init_params(key, in_channals, hidden_channals, mid_channals, out_channals):
    """Mimics torch.nn.Linear default init (U[-1/sqrt(fan_in), 1/sqrt(fan_in)]).

    Weights are returned pre-transposed to (in_features, out_features)."""
    ks = jax.random.split(key, 6)

    def lin(kw, kb, fan_in, fan_out):
        bound = 1.0 / jnp.sqrt(jnp.float32(fan_in))
        w = jax.random.uniform(kw, (fan_in, fan_out), jnp.float32, -bound, bound)
        b = jax.random.uniform(kb, (1, fan_out), jnp.float32, -bound, bound)
        return w, b

    w1, b1 = lin(ks[0], ks[1], in_channals, hidden_channals)
    w2, b2 = lin(ks[2], ks[3], hidden_channals, mid_channals)
    w3, b3 = lin(ks[4], ks[5], mid_channals, out_channals)
    return {"w1": w1, "b1": b1, "w2": w2, "b2": b2, "w3": w3, "b3": b3}


def fpn_reference_bf16(fp, p, compute_dtype=jnp.bfloat16):
    """Reference mirroring the kernel's bf16-matmul / f32-epilogue numerics."""
    cd = compute_dtype
    x = fp.astype(cd)
    h = jnp.dot(x, p["w1"].astype(cd), preferred_element_type=jnp.float32)
    h = jnp.maximum(h + p["b1"].astype(jnp.float32), 0.0)
    m = jnp.dot(h.astype(cd), p["w2"].astype(cd), preferred_element_type=jnp.float32)
    m = jnp.maximum(m + p["b2"].astype(jnp.float32), 0.0)
    o = jnp.dot(m.astype(cd), p["w3"].astype(cd), preferred_element_type=jnp.float32)
    return (o + p["b3"].astype(jnp.float32)).astype(fp.dtype)


def fpn_reference_f32(fp, p):
    h = jnp.maximum(fp @ p["w1"] + p["b1"], 0.0)
    m = jnp.maximum(h @ p["w2"] + p["b2"], 0.0)
    return m @ p["w3"] + p["b3"]


if __name__ == "__main__":
    # Small shapes consistent with the module's forward: fp = X.view(-1, in_channals)
    batch = 8
    in_channals = 32
    hidden_channals = 64
    mid_channals = 32
    out_channals = 16
    # drop_p is unused by the module's forward (no dropout is applied there).
    # TODO(synk): config-driven fingerprint selection / concat has no tensor
    # semantics here; we take the already-flattened (batch, in_channals) fingerprint.

    key = jax.random.PRNGKey(0)
    k_x, k_x2, k_p = jax.random.split(key, 3)
    fp = jax.random.normal(k_x, (batch, in_channals), jnp.float32)
    raw_params = init_params(k_p, in_channals, hidden_channals, mid_channals, out_channals)
    params = prepare_params(raw_params)  # pad/cast once, reused across calls

    out = jax.block_until_ready(fpn_forward(fp, params))
    assert out.shape == (batch, out_channals)
    ref = fpn_reference_bf16(fp, raw_params)
    assert jnp.allclose(out, ref, atol=1e-2, rtol=1e-2), "mismatch vs bf16-mirrored reference"
    ref32 = fpn_reference_f32(fp, raw_params)
    assert jnp.allclose(out, ref32, atol=1e-1, rtol=1e-1), "mismatch vs f32 reference"

    # Ragged batch: exercises batch padding, a multi-step pipelined grid
    # (5 steps -> Buffered(3) path on x), and the cached prepared params.
    fp2 = jax.random.normal(k_x2, (203, in_channals), jnp.float32)
    out2 = jax.block_until_ready(fpn_forward(fp2, params, batch_tile=48))
    assert out2.shape == (203, out_channals)
    assert jnp.allclose(out2, fpn_reference_bf16(fp2, raw_params), atol=1e-2, rtol=1e-2), (
        "mismatch vs reference (ragged batch)")

    print("KERNEL_OK")
</pallas_src>

<mosaic_0001>
module attributes {stable_mosaic.version = 11 : i64} {
  func.func @_fpn_kernel(%arg0: i32, %arg1: memref<16x32xbf16, #tpu.memory_space<vmem>>, %arg2: memref<32x128xbf16, #tpu.memory_space<vmem>>, %arg3: memref<1x128xf32, #tpu.memory_space<vmem>>, %arg4: memref<128x128xbf16, #tpu.memory_space<vmem>>, %arg5: memref<1x128xf32, #tpu.memory_space<vmem>>, %arg6: memref<128x16xbf16, #tpu.memory_space<vmem>>, %arg7: memref<1x16xf32, #tpu.memory_space<vmem>>, %arg8: memref<16x16xf32, #tpu.memory_space<vmem>>) attributes {dimension_semantics = [#tpu.dimension_semantics<parallel>], iteration_bounds = array<i64: 1>, scalar_prefetch = 0 : i64, scratch_operands = 0 : i64, tpu.core_type = #tpu.core_type<tc>, window_params = [{transform_indices = @transform_0, window_bounds = array<i64: 16, 32>}, {pipeline_mode = #tpu.pipeline_mode<synchronous>, transform_indices = @transform_1, window_bounds = array<i64: 32, 128>}, {pipeline_mode = #tpu.pipeline_mode<synchronous>, transform_indices = @transform_2, window_bounds = array<i64: 1, 128>}, {pipeline_mode = #tpu.pipeline_mode<synchronous>, transform_indices = @transform_3, window_bounds = array<i64: 128, 128>}, {pipeline_mode = #tpu.pipeline_mode<synchronous>, transform_indices = @transform_4, window_bounds = array<i64: 1, 128>}, {pipeline_mode = #tpu.pipeline_mode<synchronous>, transform_indices = @transform_5, window_bounds = array<i64: 128, 16>}, {pipeline_mode = #tpu.pipeline_mode<synchronous>, transform_indices = @transform_6, window_bounds = array<i64: 1, 16>}, {transform_indices = @transform_7, window_bounds = array<i64: 16, 16>}]} {
    %c0 = arith.constant 0 : index
    %c0_0 = arith.constant 0 : index
    %0 = vector.load %arg1[%c0, %c0_0] : memref<16x32xbf16, #tpu.memory_space<vmem>>, vector<16x32xbf16>
    %c0_1 = arith.constant 0 : index
    %c0_2 = arith.constant 0 : index
    %1 = vector.load %arg2[%c0_1, %c0_2] : memref<32x128xbf16, #tpu.memory_space<vmem>>, vector<32x128xbf16>
    %cst = arith.constant dense<0.000000e+00> : vector<16x128xf32>
    %2 = tpu.matmul %0, %1, %cst {dimension_numbers = #tpu.dot_dimension_numbers<[1], [0], [0], [1], [0, 0, 1, 1], [], []>} : vector<16x32xbf16>, vector<32x128xbf16>, vector<16x128xf32> -> vector<16x128xf32>
    %c0_3 = arith.constant 0 : index
    %c0_4 = arith.constant 0 : index
    %3 = vector.load %arg3[%c0_3, %c0_4] : memref<1x128xf32, #tpu.memory_space<vmem>>, vector<1x128xf32>
    %4 = vector.broadcast %3 : vector<1x128xf32> to vector<16x128xf32>
    %5 = arith.addf %2, %4 : vector<16x128xf32>
    %cst_5 = arith.constant 0.000000e+00 : f32
    %6 = vector.broadcast %cst_5 : f32 to vector<16x128xf32>
    %7 = arith.maximumf %5, %6 : vector<16x128xf32>
    %8 = arith.truncf %7 : vector<16x128xf32> to vector<16x128xbf16>
    %c0_6 = arith.constant 0 : index
    %c0_7 = arith.constant 0 : index
    %9 = vector.load %arg4[%c0_6, %c0_7] : memref<128x128xbf16, #tpu.memory_space<vmem>>, vector<128x128xbf16>
    %cst_8 = arith.constant dense<0.000000e+00> : vector<16x128xf32>
    %10 = tpu.matmul %8, %9, %cst_8 {dimension_numbers = #tpu.dot_dimension_numbers<[1], [0], [0], [1], [0, 0, 1, 1], [], []>} : vector<16x128xbf16>, vector<128x128xbf16>, vector<16x128xf32> -> vector<16x128xf32>
    %c0_9 = arith.constant 0 : index
    %c0_10 = arith.constant 0 : index
    %11 = vector.load %arg5[%c0_9, %c0_10] : memref<1x128xf32, #tpu.memory_space<vmem>>, vector<1x128xf32>
    %12 = vector.broadcast %11 : vector<1x128xf32> to vector<16x128xf32>
    %13 = arith.addf %10, %12 : vector<16x128xf32>
    %cst_11 = arith.constant 0.000000e+00 : f32
    %14 = vector.broadcast %cst_11 : f32 to vector<16x128xf32>
    %15 = arith.maximumf %13, %14 : vector<16x128xf32>
    %16 = arith.truncf %15 : vector<16x128xf32> to vector<16x128xbf16>
    %c0_12 = arith.constant 0 : index
    %c0_13 = arith.constant 0 : index
    %17 = vector.load %arg6[%c0_12, %c0_13] : memref<128x16xbf16, #tpu.memory_space<vmem>>, vector<128x16xbf16>
    %cst_14 = arith.constant dense<0.000000e+00> : vector<16x16xf32>
    %18 = tpu.matmul %16, %17, %cst_14 {dimension_numbers = #tpu.dot_dimension_numbers<[1], [0], [0], [1], [0, 0, 1, 1], [], []>} : vector<16x128xbf16>, vector<128x16xbf16>, vector<16x16xf32> -> vector<16x16xf32>
    %c0_15 = arith.constant 0 : index
    %c0_16 = arith.constant 0 : index
    %19 = vector.load %arg7[%c0_15, %c0_16] : memref<1x16xf32, #tpu.memory_space<vmem>>, vector<1x16xf32>
    %20 = vector.broadcast %19 : vector<1x16xf32> to vector<16x16xf32>
    %21 = arith.addf %18, %20 : vector<16x16xf32>
    %c0_17 = arith.constant 0 : index
    %c0_18 = arith.constant 0 : index
    %22 = vector.load %arg8[%c0_17, %c0_18] : memref<16x16xf32, #tpu.memory_space<vmem>>, vector<16x16xf32>
    tpu.vector_store %arg8[%c0_17, %c0_18], %21 {strides = array<i32>} : memref<16x16xf32, #tpu.memory_space<vmem>>, vector<16x16xf32>,
    return
  }
  func.func @transform_0(%arg0: i32) -> (i32, i32) {
    %c0_i32 = arith.constant 0 : i32
    %c0_i32_0 = arith.constant 0 : i32
    return %arg0, %c0_i32 : i32, i32
  }
  func.func @transform_1(%arg0: i32) -> (i32, i32) {
    %c0_i32 = arith.constant 0 : i32
    %c0_i32_0 = arith.constant 0 : i32
    %c0_i32_1 = arith.constant 0 : i32
    return %c0_i32, %c0_i32_0 : i32, i32
  }
  func.func @transform_2(%arg0: i32) -> (i32, i32) {
    %c0_i32 = arith.constant 0 : i32
    %c0_i32_0 = arith.constant 0 : i32
    %c0_i32_1 = arith.constant 0 : i32
    return %c0_i32, %c0_i32_0 : i32, i32
  }
  func.func @transform_3(%arg0: i32) -> (i32, i32) {
    %c0_i32 = arith.constant 0 : i32
    %c0_i32_0 = arith.constant 0 : i32
    %c0_i32_1 = arith.constant 0 : i32
    return %c0_i32, %c0_i32_0 : i32, i32
  }
  func.func @transform_4(%arg0: i32) -> (i32, i32) {
    %c0_i32 = arith.constant 0 : i32
    %c0_i32_0 = arith.constant 0 : i32
    %c0_i32_1 = arith.constant 0 : i32
    return %c0_i32, %c0_i32_0 : i32, i32
  }
  func.func @transform_5(%arg0: i32) -> (i32, i32) {
    %c0_i32 = arith.constant 0 : i32
    %c0_i32_0 = arith.constant 0 : i32
    %c0_i32_1 = arith.constant 0 : i32
    return %c0_i32, %c0_i32_0 : i32, i32
  }
  func.func @transform_6(%arg0: i32) -> (i32, i32) {
    %c0_i32 = arith.constant 0 : i32
    %c0_i32_0 = arith.constant 0 : i32
    %c0_i32_1 = arith.constant 0 : i32
    return %c0_i32, %c0_i32_0 : i32, i32
  }
  func.func @transform_7(%arg0: i32) -> (i32, i32) {
    %c0_i32 = arith.constant 0 : i32
    %c0_i32_0 = arith.constant 0 : i32
    return %arg0, %c0_i32 : i32, i32
  }
}

</mosaic_0001>

<bundles_post_ra>
// kernel: tpu_custom_call.1
= control target key start
LH: loop header
LB: loop body
LE: loop exit
PB: predicated region body
PF: predicated region fallthrough
CT: control target
= control target key end

     0   :  { %12 = vsyncpa [#allocation3], 0  ;;  %s705_s0 = inlined_call_operand.vmem [shape: bf16[16,32], index: 0, kind: input, shape index: {}]   ;;  %s706_s1 = inlined_call_operand.hbm [shape: bf16[32,128], index: 1, kind: input, shape index: {}]   ;;  %s707_s2 = inlined_call_operand.vmem [shape: f32[1,128], index: 2, kind: input, shape index: {}]   ;;  %s708_s3 = inlined_call_operand.vmem [shape: bf16[128,128], index: 3, kind: input, shape index: {}]   ;;  %s709_s4 = inlined_call_operand.hbm [shape: f32[1,128], index: 4, kind: input, shape index: {}]   ;;  %s710_s5 = inlined_call_operand.vmem [shape: bf16[128,16], index: 5, kind: input, shape index: {}]   ;;  %s711_s6 = inlined_call_operand.vmem [shape: f32[1,16], index: 6, kind: input, shape index: {}]   ;;  %s712_s7 = inlined_call_operand.hbm [shape: f32[16,16], index: 7, kind: output, shape index: {}]  }
   0x1   :  { %13 = vsyncpa [#allocation6], 0 }
   0x2   :  { %14 = vsyncpa [#allocation4], 0  ;;  %s566_s24 = smov [#allocation2]  }
   0x3   :  { %s22_s25 = sshll.u32 %s566_s24, 4  ;;  %s23_s25 = int_to_ptr.vmem [resolvable:$true] %s22_s25 }
   0x4   :  { %s508_s26 = scalar_lea.vmem %s23_s25, 256  ;;  %p513_p1 = scmp.lt.s32.totalorder %s23_s25, %s23_s25 }
   0x5   :  { %p509_p0 = scmp.ne.s32.totalorder %s23_s25, %s508_s26  ;;  %p514_p2 = scmp.lt.s32.totalorder %s508_s26, %s508_s26 }
   0x7   :  { %p515_p3 = por %p514_p2, %p513_p1 }
   0x9   :  { %p516_p4 = pnand %p515_p3, %p509_p0 }
   0xb   :  { %519 = shalt.err (!%p516_p4)
}
   0xc   :  { %s567_s27 = smov 64   ;;  %s568_s28 = smov 4  }
   0xd   :  { %28 = dma.hbm_to_vmem [thread:$0]  %s706_s1, 256, %s23_s25, [#allocation3], %s567_s27, %s567_s27, %s568_s28  }
   0xe   :  { %s569_s8 = smov [#allocation5]  }
   0xf   :  { %s39_s9 = sshll.u32 %s569_s8, 4  ;;  %s40_s9 = int_to_ptr.vmem [resolvable:$true] %s39_s9 }
  0x10   :  { %s528_s10 = scalar_lea.vmem %s40_s9, 16  ;;  %s532_s11 = scalar_lea.vmem %s40_s9, 32 }
  0x11   :  { %p529_p5 = scmp.ne.s32.totalorder %s40_s9, %s528_s10  ;;  %p533_p6 = scmp.lt.s32.totalorder %s40_s9, %s40_s9 }
  0x12   :  { %p534_p7 = scmp.lt.s32.totalorder %s532_s11, %s528_s10 }
  0x14   :  { %p535_p8 = por %p534_p7, %p533_p6 }
  0x16   :  { %p536_p9 = pnand %p535_p8, %p529_p5 }
  0x18   :  { %539 = shalt.err (!%p536_p9)
}
  0x19   :  { %42 = dma.hbm_to_vmem [thread:$0]  %s709_s4, 16, %s40_s9, [#allocation6]  }
  0x1a   :  { %560 = dma.done.wait [#allocation3], 256  }
  0x1b   :  { %561 = vsyncadd [#allocation3], 4294967040 }
  0x1c   :  { %562 = dma.done.wait [#allocation6], 16  }
  0x1d   :  { %563 = vsyncadd [#allocation6], 4294967280  ;;  %v570_v0 = vmov 0.0   ;;  %vm571_vm0 = vmmov 0   ;;  %v481_v1 = vld [vmem:[#allocation2 + $0x8] sm:$0xff]   ;;  %v482_v2 = vld [vmem:[#allocation2] sm:$0xff]  }
  0x1e   :  { %424 = vmatprep.subr.bf16.mxu0 %v570_v0  ;;  %428 = vmatprep.mubr.msk.bf16.mxu0 %vm571_vm0, %v570_v0  ;;  %v484_v3 = vld [vmem:[%s708_s3 + $0x38] sm:$0xff]   ;;  %v483_v4 = vld [vmem:[%s705_s0] sm:$0xff]   ;;  %v485_v5 = vld [vmem:[%s708_s3 + $0x30] sm:$0xff]   ;;  %vm84_vm1 = vcmask 261120   ;;  %vm359_vm2 = vcmask 130048  }
  0x1f   :  { %432 = vmatprep.subr.bf16.mxu1 %v570_v0  ;;  %448 = vmatprep.mubr.msk.bf16.mxu1 %vm571_vm0, %v570_v0  ;;  %v486_v6 = vld [vmem:[%s708_s3 + $0x28] sm:$0xff]   ;;  %v487_v7 = vld [vmem:[%s708_s3 + $0x20] sm:$0xff]   ;;  %v488_v8 = vld [vmem:[%s708_s3 + $0x18] sm:$0xff]  }
  0x20   :  { %425 = vmatpush3.bf16.msra.mxu0 %v481_v1  ;;  %433 = vmatpush3.bf16.msra.mxu1 %v484_v3  ;;  %v489_v9 = vld [vmem:[%s708_s3 + $0x10] sm:$0xff]   ;;  %v490_v10 = vld [vmem:[%s708_s3 + $0x8] sm:$0xff]   ;;  %v491_v11 = vld [vmem:[%s708_s3] sm:$0xff]  }
  0x21   :  { %426 = vmatprep.subr.bf16.mxu0 %v570_v0  ;;  %434 = vmatprep.subr.bf16.mxu1 %v570_v0  ;;  %v492_v12 = vld [vmem:[%s710_s5 + $0x38] sm:$0xff]   ;;  %v493_v13 = vld [vmem:[%s710_s5 + $0x30] sm:$0xff]   ;;  %v494_v14 = vld [vmem:[%s710_s5 + $0x28] sm:$0xff]  }
  0x22   :  { %v495_v15 = vld [vmem:[%s710_s5 + $0x20] sm:$0xff]   ;;  %v496_v16 = vld [vmem:[%s710_s5 + $0x18] sm:$0xff]   ;;  %v497_v27 = vld [vmem:[%s710_s5 + $0x10] sm:$0xff]  }
  0x23   :  { %v380_v17 = vld [vmem:[%s707_s2] ss:$0 sm:$0xff]  ;;  %v498_v28 = vld [vmem:[%s710_s5 + $0x8] sm:$0xff]   ;;  %v385_v30 = vld [vmem:[#allocation5] ss:$0 sm:$0xff] }
  0x24   :  { %427 = vmatpush3.bf16.msra.mxu0 %v482_v2  ;;  %435 = vmatpush3.bf16.msra.mxu1 %v485_v5  ;;  %v499_v29 = vld [vmem:[%s710_s5] sm:$0xff]   ;;  %s572_s5 = smov [#allocation7]  }
  0x25   :  { %452 = vmatprep.subr.bf16.mxu0 %v570_v0  ;;  %436 = vmatprep.subr.bf16.mxu1 %v570_v0  ;;  %v394_v40 = vld [vmem:[%s711_s6] ss:$0 sm:$0xff]  ;;  %s367_s21 = sshll.u32 %s572_s5, 4  ;;  %s368_s21 = int_to_ptr.vmem [resolvable:$true] %s367_s21 }
  0x26   :  { %s540_s22 = scalar_lea.vmem %s368_s21, 256  ;;  %p545_p11 = scmp.lt.s32.totalorder %s368_s21, %s368_s21 }
  0x27   :  { %429 = vmatmul.mubr.msk.bf16.vlgmr.msra.gmra.mxu0 %vm84_vm1, %v483_v4  ;;  %p541_p10 = scmp.ne.s32.totalorder %s368_s21, %s540_s22  ;;  %p546_p12 = scmp.lt.s32.totalorder %s540_s22, %s540_s22 }
  0x28   :  { %468 = vmatprep.mubr.msk.bf16.mxu0 %vm571_vm0, %v570_v0  ;;  %437 = vmatpush3.bf16.msra.mxu1 %v486_v6 }
  0x29   :  { %438 = vmatprep.subr.bf16.mxu1 %v570_v0  ;;  %453 = vmatpush3.bf16.msra.mxu0 %v492_v12  ;;  %p547_p13 = por %p546_p12, %p545_p11 }
  0x2a   :  { %454 = vmatprep.subr.bf16.mxu0 %v570_v0 }
  0x2b   :  { %p548_p0 = pnand %p547_p13, %p541_p10 }
  0x2c   :  { %439 = vmatpush3.bf16.msra.mxu1 %v487_v7 }
  0x2d   :  { %440 = vmatprep.subr.bf16.mxu1 %v570_v0  ;;  %455 = vmatpush3.bf16.msra.mxu0 %v493_v13 }
  0x2e   :  { %456 = vmatprep.subr.bf16.mxu0 %v570_v0 }
  0x30   :  { %441 = vmatpush3.bf16.msra.mxu1 %v488_v8 }
  0x31   :  { %442 = vmatprep.subr.bf16.mxu1 %v570_v0  ;;  %457 = vmatpush3.bf16.msra.mxu0 %v494_v14 }
  0x32   :  { %458 = vmatprep.subr.bf16.mxu0 %v570_v0 }
  0x34   :  { %443 = vmatpush3.bf16.msra.mxu1 %v489_v9 }
  0x35   :  { %444 = vmatprep.subr.bf16.mxu1 %v570_v0  ;;  %459 = vmatpush3.bf16.msra.mxu0 %v495_v15 }
  0x36   :  { %460 = vmatprep.subr.bf16.mxu0 %v570_v0 }
  0x38   :  { %445 = vmatpush3.bf16.msra.mxu1 %v490_v10 }
  0x39   :  { %446 = vmatprep.subr.bf16.mxu1 %v570_v0  ;;  %461 = vmatpush3.bf16.msra.mxu0 %v496_v16 }
  0x3a   :  { %462 = vmatprep.subr.bf16.mxu0 %v570_v0 }
  0x3c   :  { %447 = vmatpush3.bf16.msra.mxu1 %v491_v11 }
  0x3d   :  { %463 = vmatpush3.bf16.msra.mxu0 %v497_v27 }
  0x3e   :  { %464 = vmatprep.subr.bf16.mxu0 %v570_v0 }
  0x41   :  { %465 = vmatpush3.bf16.msra.mxu0 %v498_v28 }
  0x42   :  { %466 = vmatprep.subr.bf16.mxu0 %v570_v0 }
  0x45   :  { %467 = vmatpush3.bf16.msra.mxu0 %v499_v29 }
  0xe7   :  { %v122_v18 = vpop.f32.mrf.mxu0 }
  0xe8   :  { %v123_v20 = vadd.f32 %v380_v17, %v122_v18 }
  0xe9   :  { %v430_v19 = vpop.f32.mrf.mxu0 }
  0xea   :  { %v129_v24 = vmax.f32 %v123_v20, 0.0 }
  0xeb   :  { %v125_v21 = vpop.f32.mrf.mxu0 }
  0xec   :  { %v126_v22 = vadd.f32 %v380_v17, %v125_v21 }
  0xed   :  { %v431_v23 = vpop.f32.mrf.mxu0 }
  0xee   :  { %v130_v25 = vmax.f32 %v126_v22, 0.0 }
  0xf0   :  { %v131_v26 = vpack.c.bf16 %v130_v25, %v129_v24 }
  0xf2   :  { %449 = vmatmul.mubr.bf16.vlgmr.msra.gmra.mxu1 %v131_v26 }
 0x1b2   :  { %v237_v31 = vpop.f32.mrf.mxu1 }
 0x1b3   :  { %v238_v33 = vadd.f32 %v385_v30, %v237_v31 }
 0x1b4   :  { %v450_v32 = vpop.f32.mrf.mxu1 }
 0x1b5   :  { %v244_v37 = vmax.f32 %v238_v33, 0.0 }
 0x1b6   :  { %v240_v34 = vpop.f32.mrf.mxu1 }
 0x1b7   :  { %v241_v35 = vadd.f32 %v385_v30, %v240_v34 }
 0x1b8   :  { %v451_v36 = vpop.f32.mrf.mxu1 }
 0x1b9   :  { %v245_v38 = vmax.f32 %v241_v35, 0.0 }
 0x1bb   :  { %v246_v39 = vpack.c.bf16 %v245_v38, %v244_v37 }
 0x1bd   :  { %469 = vmatmul.mubr.bf16.vlgmr.msra.gmra.mxu0 %v246_v39 }
 0x27d   :  { %v352_v41 = vpop.f32.mrf.mxu0 }
 0x27e   :  { %v353_v42 = vadd.f32 %v394_v40, %v352_v41 }
 0x27f   :  { %v470_v43 = vpop.f32.mrf.mxu0 }
 0x280   :  { %360 = vst.msk [vmem:[#allocation7] sm:$0xff] %vm359_vm2, %v353_v42 }
 0x281   :  { %v355_v44 = vpop.f32.mrf.mxu0 }
 0x282   :  { %v356_v45 = vadd.f32 %v394_v40, %v355_v44 }
 0x283   :  { %v471_v46 = vpop.f32.mrf.mxu0 }
 0x284   :  { %361 = vst.msk [vmem:[#allocation7 + $0x8] sm:$0xff] %vm359_vm2, %v356_v45 }
 0x285   :  { %551 = shalt.err (!%p548_p0)
}
 0x286   :  { %s573_s6 = smov 128   ;;  %s574_s23 = smov 8  }
 0x287   :  { %373 = dma.vmem_to_hbm [thread:$0]  %s368_s21, 256, %s712_s7, [#allocation4], %s573_s6, %s573_s6, %s574_s23  }
 0x288   :  { %564 = dma.done.wait [#allocation4], 256  }
 0x289   :  { %565 = vsyncadd [#allocation4], 4294967040 }
 0x28a   :  { %377 = vsyncpa [#allocation3], 1 }
 0x28b   :  { %378 = vsyncpa [#allocation6], 1 }
 0x28c   :  { %379 = vsyncpa [#allocation4], 1 }

</bundles_post_ra>
